<compile_context>
chip_gen: v6e
topology: v6e:2x2x1
jax: 0.10.0
libtpu: 0.0.40
codegen_flags: <defaults>
</compile_context>

<pallas_src>
from typing import NamedTuple

import jax
import jax.numpy as jnp
from jax.experimental import pallas as pl
from jax.experimental.pallas import tpu as pltpu


def _round_up(x: int, m: int) -> int:
    return (x + m - 1) // m * m


_TM_MAX = 512                       # max batch-tile rows
_VMEM_BUDGET = 40 * (1 << 20)       # target footprint, safe on v7x (64 MiB VMEM)


# ---------------------------------------------------------------------------
# Kernel: one (batch-tile, hidden-tile, input-tile) grid step.
# ---------------------------------------------------------------------------
def _mlp_kernel(x_ref, w1_ref, b1_ref, w2_ref, b2_ref, o_ref, h_acc, y_acc):
    j = pl.program_id(1)            # hidden-feature tile (reduction of matmul-2)
    k = pl.program_id(2)            # input-feature tile  (reduction of matmul-1)
    nj = pl.num_programs(1)
    nk = pl.num_programs(2)

    @pl.when((j == 0) & (k == 0))
    def _():
        y_acc[...] = jnp.zeros_like(y_acc)

    @pl.when(k == 0)
    def _():
        h_acc[...] = jnp.zeros_like(h_acc)

    # Layer-1 partial product on the MXU; f32 accumulation in VMEM scratch.
    h_acc[...] += jnp.dot(x_ref[...], w1_ref[...],
                          preferred_element_type=jnp.float32)

    @pl.when(k == nk - 1)
    def _():
        # Finish layer 1 (bias + ReLU in f32 on the VPU), then layer-2 partial
        # product for this hidden tile, accumulated in f32.
        h = jnp.maximum(h_acc[...] + b1_ref[...], 0.0)
        y_acc[...] += jnp.dot(h.astype(w2_ref.dtype), w2_ref[...],
                              preferred_element_type=jnp.float32)

        @pl.when(j == nj - 1)
        def _():
            o_ref[...] = (y_acc[...] + b2_ref[...]).astype(o_ref.dtype)


# ---------------------------------------------------------------------------
# Parameter preparation (pad / cast once, outside the per-call forward path).
# ---------------------------------------------------------------------------
class ClassifierParams(NamedTuple):
    w1: jax.Array            # [Dp, Hp]  compute dtype, zero padded
    b1: jax.Array            # [1,  Hp]  float32
    w2: jax.Array            # [Hp, Cp]  compute dtype, zero padded
    b2: jax.Array            # [1,  Cp]  float32
    d_in: int
    hidden: int
    n_classes: int
    tile_d: int
    tile_h: int
    compute_dtype: jnp.dtype


def _vmem_estimate(tm, td, th, cp, comp_isize, out_isize):
    b = 2 * (tm * td + td * th + th * cp) * comp_isize   # 2x-buffered x, W1, W2 tiles
    b += 2 * (th + cp) * 4                               # b1 / b2 tiles
    b += 2 * tm * cp * out_isize                         # 2x-buffered output tile
    b += (tm * th + tm * cp) * 4                         # f32 accumulator scratch
    return b


def _choose_tiles(d_in, hidden, n_classes, comp_isize, out_isize):
    td = _round_up(d_in, 128)
    th = _round_up(hidden, 128)
    cp = _round_up(n_classes, 128)
    # Shrink the reduction-dim tiles until the worst-case (TM_MAX) footprint
    # fits the VMEM budget.  128 is the floor (one lane-width).
    while (_vmem_estimate(_TM_MAX, td, th, cp, comp_isize, out_isize) > _VMEM_BUDGET
           and (td > 128 or th > 128)):
        if th >= td and th > 128:
            th = max(128, _round_up(th // 2, 128))
        else:
            td = max(128, _round_up(td // 2, 128))
    return td, th


def prepare_classifier_params(w1, b1, w2, b2, *, compute_dtype=None,
                              tile_d=None, tile_h=None):
    """Pad / cast the MLP parameters once (hoisted out of the forward pass).

    w1: [D_in, H] (pre-transposed), b1: [H], w2: [H, C], b2: [C].
    compute_dtype: MXU operand dtype (pass jnp.bfloat16 on v6e/v7x for ~2x MXU
    throughput; accumulation and bias/ReLU stay f32 either way).
    """
    d_in, hidden = w1.shape
    n_classes = w2.shape[1]
    if compute_dtype is None:
        compute_dtype = w1.dtype
    compute_dtype = jnp.dtype(compute_dtype)
    comp_isize = compute_dtype.itemsize

    if tile_d is None or tile_h is None:
        auto_td, auto_th = _choose_tiles(d_in, hidden, n_classes,
                                         comp_isize, comp_isize)
        tile_d = tile_d or auto_td
        tile_h = tile_h or auto_th

    dp = _round_up(d_in, tile_d)
    hp = _round_up(hidden, tile_h)
    cp = _round_up(n_classes, 128)

    # Zero padding is mathematically exact: padded x columns hit zero W1 rows,
    # padded hidden units get bias 0 -> ReLU 0 -> zero W2 rows, and padded
    # output columns are sliced off in the wrapper.
    w1_p = jnp.zeros((dp, hp), compute_dtype).at[:d_in, :hidden].set(
        w1.astype(compute_dtype))
    w2_p = jnp.zeros((hp, cp), compute_dtype).at[:hidden, :n_classes].set(
        w2.astype(compute_dtype))
    b1_p = jnp.zeros((1, hp), jnp.float32).at[0, :hidden].set(
        b1.astype(jnp.float32))
    b2_p = jnp.zeros((1, cp), jnp.float32).at[0, :n_classes].set(
        b2.astype(jnp.float32))
    return ClassifierParams(w1_p, b1_p, w2_p, b2_p, d_in, hidden, n_classes,
                            tile_d, tile_h, compute_dtype)


def _pick_tm(batch):
    if batch <= 128:
        return _round_up(max(batch, 1), 16)      # one tile; tiny batch
    # At least 2 tiles (so both v7x TensorCores get work), balanced, <= 512 rows.
    n_tiles = max(2, pl.cdiv(batch, _TM_MAX))
    return min(_TM_MAX, _round_up(pl.cdiv(batch, n_tiles), 16))


# ---------------------------------------------------------------------------
# Forward pass.
# ---------------------------------------------------------------------------
def classifier_forward(x, params: ClassifierParams):
    """y = ReLU(x @ W1 + b1) @ W2 + b2  (identical math to the PyTorch module)."""
    out_dtype = x.dtype
    cdtype = params.compute_dtype
    batch, d_in = x.shape
    assert d_in == params.d_in, "input feature size mismatch"

    dp, hp = params.w1.shape
    cp = params.w2.shape[1]
    td, th = params.tile_d, params.tile_h

    tm = _pick_tm(batch)
    # Only tiny batches (smaller than one tile) get row-padded; otherwise the
    # grid is ragged and Pallas masks the edge-block stores (rows independent).
    bp = tm if batch < tm else batch

    if d_in != dp or bp != batch:
        x_c = jnp.zeros((bp, dp), cdtype).at[:batch, :d_in].set(x.astype(cdtype))
    elif x.dtype != cdtype:
        x_c = x.astype(cdtype)
    else:
        x_c = x

    grid = (pl.cdiv(bp, tm), hp // th, dp // td)

    comp_isize = jnp.dtype(cdtype).itemsize
    out_isize = jnp.dtype(out_dtype).itemsize
    est = _vmem_estimate(tm, td, th, cp, comp_isize, out_isize)
    # Explicit scoped-VMEM limit: well above v5e's 16 MiB default, within
    # v7x's 64 MiB physical VMEM.
    vmem_limit = int(min(max(2 * est, 32 * (1 << 20)), 56 * (1 << 20)))

    cost = pl.CostEstimate(
        flops=2 * batch * (d_in * params.hidden
                           + params.hidden * params.n_classes),
        transcendentals=0,
        bytes_accessed=int(x.size * x.dtype.itemsize
                           + (params.w1.size + params.w2.size) * comp_isize
                           + (params.b1.size + params.b2.size) * 4
                           + batch * cp * out_isize),
    )

    out = pl.pallas_call(
        _mlp_kernel,
        out_shape=jax.ShapeDtypeStruct((bp, cp), out_dtype),
        grid=grid,
        in_specs=[
            pl.BlockSpec((tm, td), lambda i, j, k: (i, k)),   # x (batch tiled)
            pl.BlockSpec((td, th), lambda i, j, k: (k, j)),   # W1 tile
            pl.BlockSpec((1, th), lambda i, j, k: (0, j)),    # b1 tile
            pl.BlockSpec((th, cp), lambda i, j, k: (j, 0)),   # W2 tile
            pl.BlockSpec((1, cp), lambda i, j, k: (0, 0)),    # b2 (resident)
        ],
        out_specs=pl.BlockSpec((tm, cp), lambda i, j, k: (i, 0)),
        scratch_shapes=[
            pltpu.VMEM((tm, th), jnp.float32),   # layer-1 f32 accumulator
            pltpu.VMEM((tm, cp), jnp.float32),   # layer-2 f32 accumulator
        ],
        compiler_params=pltpu.CompilerParams(
            dimension_semantics=("parallel", "arbitrary", "arbitrary"),
            vmem_limit_bytes=vmem_limit,
        ),
        cost_estimate=cost,
    )(x_c, params.w1, params.b1, params.w2, params.b2)

    if bp != batch or cp != params.n_classes:
        out = out[:batch, :params.n_classes]
    return out


# ---------------------------------------------------------------------------
# Demo / self-test.
# ---------------------------------------------------------------------------
if __name__ == "__main__":
    key = jax.random.PRNGKey(0)
    k1, k2, k3, k4, kx, kx2, kx3 = jax.random.split(key, 7)

    # Small shapes consistent with the module: x is [batch, input_shape].
    batch, d_in, hidden, n_classes = 8, 32, 64, 16
    bound1 = 1.0 / jnp.sqrt(d_in)
    bound2 = 1.0 / jnp.sqrt(hidden)
    w1 = jax.random.uniform(k1, (d_in, hidden), jnp.float32, -bound1, bound1)
    b1 = jax.random.uniform(k2, (hidden,), jnp.float32, -bound1, bound1)
    w2 = jax.random.uniform(k3, (hidden, n_classes), jnp.float32, -bound2, bound2)
    b2 = jax.random.uniform(k4, (n_classes,), jnp.float32, -bound2, bound2)
    x = jax.random.normal(kx, (batch, d_in), jnp.float32)

    ref = jnp.maximum(x @ w1 + b1, 0.0) @ w2 + b2

    # f32 path: pad/cast the parameters ONCE, reuse across calls.
    params = prepare_classifier_params(w1, b1, w2, b2)
    out = jax.block_until_ready(classifier_forward(x, params))
    assert out.shape == (batch, n_classes)
    assert jnp.allclose(out, ref, atol=1e-5, rtol=1e-5)

    # bf16 MXU operands (f32 accumulation): tolerance-level match.
    params_bf16 = prepare_classifier_params(w1, b1, w2, b2,
                                            compute_dtype=jnp.bfloat16)
    out_bf16 = jax.block_until_ready(classifier_forward(x, params_bf16))
    assert out_bf16.shape == (batch, n_classes)
    assert jnp.allclose(out_bf16, ref, atol=1e-1, rtol=5e-2)

    # Larger ragged batch: 2 balanced "parallel" batch tiles, no batch padding
    # (edge-block stores are masked by Pallas), weights reused from `params`.
    x_big = jax.random.normal(kx2, (300, d_in), jnp.float32)
    ref_big = jnp.maximum(x_big @ w1 + b1, 0.0) @ w2 + b2
    out_big = jax.block_until_ready(classifier_forward(x_big, params))
    assert out_big.shape == (300, n_classes)
    assert jnp.allclose(out_big, ref_big, atol=1e-5, rtol=1e-5)

    # Forced multi-tile path (tile_d / tile_h overrides): exercises the
    # K-reduction grid axes + f32 accumulator scratch used for production-
    # sized layers, at small shapes.
    d2, h2, c2, nb2 = 200, 384, 150, 64
    w1b = jax.random.uniform(k1, (d2, h2), jnp.float32, -1.0, 1.0) * 0.05
    b1b = jax.random.uniform(k2, (h2,), jnp.float32, -1.0, 1.0) * 0.05
    w2b = jax.random.uniform(k3, (h2, c2), jnp.float32, -1.0, 1.0) * 0.05
    b2b = jax.random.uniform(k4, (c2,), jnp.float32, -1.0, 1.0) * 0.05
    x_t = jax.random.normal(kx3, (nb2, d2), jnp.float32)
    ref_t = jnp.maximum(x_t @ w1b + b1b, 0.0) @ w2b + b2b
    params_t = prepare_classifier_params(w1b, b1b, w2b, b2b,
                                         tile_d=128, tile_h=128)
    out_t = jax.block_until_ready(classifier_forward(x_t, params_t))
    assert out_t.shape == (nb2, c2)
    assert jnp.allclose(out_t, ref_t, atol=1e-2, rtol=1e-2)

    print("KERNEL_OK")
</pallas_src>

<mosaic_0001>
module attributes {stable_mosaic.version = 11 : i64} {
  func.func @_mlp_kernel(%arg0: i32, %arg1: i32, %arg2: i32, %arg3: memref<16x128xf32, #tpu.memory_space<vmem>>, %arg4: memref<128x128xf32, #tpu.memory_space<vmem>>, %arg5: memref<1x128xf32, #tpu.memory_space<vmem>>, %arg6: memref<128x128xf32, #tpu.memory_space<vmem>>, %arg7: memref<1x128xf32, #tpu.memory_space<vmem>>, %arg8: memref<16x128xf32, #tpu.memory_space<vmem>>, %arg9: memref<16x128xf32, #tpu.memory_space<vmem>>, %arg10: memref<16x128xf32, #tpu.memory_space<vmem>>) attributes {dimension_semantics = [#tpu.dimension_semantics<parallel>, #tpu.dimension_semantics<arbitrary>, #tpu.dimension_semantics<arbitrary>], iteration_bounds = array<i64: 1, 1, 1>, scalar_prefetch = 0 : i64, scratch_operands = 2 : i64, tpu.core_type = #tpu.core_type<tc>, window_params = [{transform_indices = @transform_0, window_bounds = array<i64: 16, 128>}, {transform_indices = @transform_1, window_bounds = array<i64: 128, 128>}, {transform_indices = @transform_2, window_bounds = array<i64: 1, 128>}, {transform_indices = @transform_3, window_bounds = array<i64: 128, 128>}, {pipeline_mode = #tpu.pipeline_mode<synchronous>, transform_indices = @transform_4, window_bounds = array<i64: 1, 128>}, {transform_indices = @transform_5, window_bounds = array<i64: 16, 128>}]} {
    %c0_i32 = arith.constant 0 : i32
    %0 = arith.cmpi eq, %arg1, %c0_i32 : i32
    %c0_i32_0 = arith.constant 0 : i32
    %1 = arith.cmpi eq, %arg2, %c0_i32_0 : i32
    %2 = arith.andi %0, %1 : i1
    %3 = arith.extui %2 : i1 to i32
    %c0_i32_1 = arith.constant 0 : i32
    %4 = arith.cmpi ne, %3, %c0_i32_1 : i32
    scf.if %4 {
      %cst_13 = arith.constant 0.000000e+00 : f32
      %17 = vector.broadcast %cst_13 : f32 to vector<16x128xf32>
      %c0_14 = arith.constant 0 : index
      %c0_15 = arith.constant 0 : index
      %18 = vector.load %arg10[%c0_14, %c0_15] : memref<16x128xf32, #tpu.memory_space<vmem>>, vector<16x128xf32>
      tpu.vector_store %arg10[%c0_14, %c0_15], %17 {strides = array<i32>} : memref<16x128xf32, #tpu.memory_space<vmem>>, vector<16x128xf32>,
    } else {
    }
    %c0_i32_2 = arith.constant 0 : i32
    %5 = arith.cmpi eq, %arg2, %c0_i32_2 : i32
    %6 = arith.extui %5 : i1 to i32
    %c0_i32_3 = arith.constant 0 : i32
    %7 = arith.cmpi ne, %6, %c0_i32_3 : i32
    scf.if %7 {
      %cst_13 = arith.constant 0.000000e+00 : f32
      %17 = vector.broadcast %cst_13 : f32 to vector<16x128xf32>
      %c0_14 = arith.constant 0 : index
      %c0_15 = arith.constant 0 : index
      %18 = vector.load %arg9[%c0_14, %c0_15] : memref<16x128xf32, #tpu.memory_space<vmem>>, vector<16x128xf32>
      tpu.vector_store %arg9[%c0_14, %c0_15], %17 {strides = array<i32>} : memref<16x128xf32, #tpu.memory_space<vmem>>, vector<16x128xf32>,
    } else {
    }
    %c0 = arith.constant 0 : index
    %c0_4 = arith.constant 0 : index
    %8 = vector.load %arg9[%c0, %c0_4] : memref<16x128xf32, #tpu.memory_space<vmem>>, vector<16x128xf32>
    %c0_5 = arith.constant 0 : index
    %c0_6 = arith.constant 0 : index
    %9 = vector.load %arg3[%c0_5, %c0_6] : memref<16x128xf32, #tpu.memory_space<vmem>>, vector<16x128xf32>
    %c0_7 = arith.constant 0 : index
    %c0_8 = arith.constant 0 : index
    %10 = vector.load %arg4[%c0_7, %c0_8] : memref<128x128xf32, #tpu.memory_space<vmem>>, vector<128x128xf32>
    %cst = arith.constant dense<0.000000e+00> : vector<16x128xf32>
    %11 = tpu.matmul %9, %10, %cst {dimension_numbers = #tpu.dot_dimension_numbers<[1], [0], [0], [1], [0, 0, 1, 1], [], []>} : vector<16x128xf32>, vector<128x128xf32>, vector<16x128xf32> -> vector<16x128xf32>
    %12 = arith.addf %8, %11 : vector<16x128xf32>
    %c0_9 = arith.constant 0 : index
    %c0_10 = arith.constant 0 : index
    %13 = vector.load %arg9[%c0_9, %c0_10] : memref<16x128xf32, #tpu.memory_space<vmem>>, vector<16x128xf32>
    tpu.vector_store %arg9[%c0_9, %c0_10], %12 {strides = array<i32>} : memref<16x128xf32, #tpu.memory_space<vmem>>, vector<16x128xf32>,
    %c0_i32_11 = arith.constant 0 : i32
    %14 = arith.cmpi eq, %arg2, %c0_i32_11 : i32
    %15 = arith.extui %14 : i1 to i32
    %c0_i32_12 = arith.constant 0 : i32
    %16 = arith.cmpi ne, %15, %c0_i32_12 : i32
    scf.if %16 {
      %c0_13 = arith.constant 0 : index
      %c0_14 = arith.constant 0 : index
      %17 = vector.load %arg9[%c0_13, %c0_14] : memref<16x128xf32, #tpu.memory_space<vmem>>, vector<16x128xf32>
      %c0_15 = arith.constant 0 : index
      %c0_16 = arith.constant 0 : index
      %18 = vector.load %arg5[%c0_15, %c0_16] : memref<1x128xf32, #tpu.memory_space<vmem>>, vector<1x128xf32>
      %19 = vector.broadcast %18 : vector<1x128xf32> to vector<16x128xf32>
      %20 = arith.addf %17, %19 : vector<16x128xf32>
      %cst_17 = arith.constant 0.000000e+00 : f32
      %21 = vector.broadcast %cst_17 : f32 to vector<16x128xf32>
      %22 = arith.maximumf %20, %21 : vector<16x128xf32>
      %c0_18 = arith.constant 0 : index
      %c0_19 = arith.constant 0 : index
      %23 = vector.load %arg10[%c0_18, %c0_19] : memref<16x128xf32, #tpu.memory_space<vmem>>, vector<16x128xf32>
      %c0_20 = arith.constant 0 : index
      %c0_21 = arith.constant 0 : index
      %24 = vector.load %arg6[%c0_20, %c0_21] : memref<128x128xf32, #tpu.memory_space<vmem>>, vector<128x128xf32>
      %cst_22 = arith.constant dense<0.000000e+00> : vector<16x128xf32>
      %25 = tpu.matmul %22, %24, %cst_22 {dimension_numbers = #tpu.dot_dimension_numbers<[1], [0], [0], [1], [0, 0, 1, 1], [], []>} : vector<16x128xf32>, vector<128x128xf32>, vector<16x128xf32> -> vector<16x128xf32>
      %26 = arith.addf %23, %25 : vector<16x128xf32>
      %c0_23 = arith.constant 0 : index
      %c0_24 = arith.constant 0 : index
      %27 = vector.load %arg10[%c0_23, %c0_24] : memref<16x128xf32, #tpu.memory_space<vmem>>, vector<16x128xf32>
      tpu.vector_store %arg10[%c0_23, %c0_24], %26 {strides = array<i32>} : memref<16x128xf32, #tpu.memory_space<vmem>>, vector<16x128xf32>,
      %c0_i32_25 = arith.constant 0 : i32
      %28 = arith.cmpi eq, %arg1, %c0_i32_25 : i32
      %29 = arith.extui %28 : i1 to i32
      %c0_i32_26 = arith.constant 0 : i32
      %30 = arith.cmpi ne, %29, %c0_i32_26 : i32
      scf.if %30 {
        %c0_27 = arith.constant 0 : index
        %c0_28 = arith.constant 0 : index
        %31 = vector.load %arg10[%c0_27, %c0_28] : memref<16x128xf32, #tpu.memory_space<vmem>>, vector<16x128xf32>
        %c0_29 = arith.constant 0 : index
        %c0_30 = arith.constant 0 : index
        %32 = vector.load %arg7[%c0_29, %c0_30] : memref<1x128xf32, #tpu.memory_space<vmem>>, vector<1x128xf32>
        %33 = vector.broadcast %32 : vector<1x128xf32> to vector<16x128xf32>
        %34 = arith.addf %31, %33 : vector<16x128xf32>
        %c0_31 = arith.constant 0 : index
        %c0_32 = arith.constant 0 : index
        %35 = vector.load %arg8[%c0_31, %c0_32] : memref<16x128xf32, #tpu.memory_space<vmem>>, vector<16x128xf32>
        tpu.vector_store %arg8[%c0_31, %c0_32], %34 {strides = array<i32>} : memref<16x128xf32, #tpu.memory_space<vmem>>, vector<16x128xf32>,
      } else {
      }
    } else {
    }
    return
  }
  func.func @transform_0(%arg0: i32, %arg1: i32, %arg2: i32) -> (i32, i32) {
    %c0_i32 = arith.constant 0 : i32
    return %arg0, %arg2 : i32, i32
  }
  func.func @transform_1(%arg0: i32, %arg1: i32, %arg2: i32) -> (i32, i32) {
    %c0_i32 = arith.constant 0 : i32
    return %arg2, %arg1 : i32, i32
  }
  func.func @transform_2(%arg0: i32, %arg1: i32, %arg2: i32) -> (i32, i32) {
    %c0_i32 = arith.constant 0 : i32
    %c0_i32_0 = arith.constant 0 : i32
    return %c0_i32, %arg1 : i32, i32
  }
  func.func @transform_3(%arg0: i32, %arg1: i32, %arg2: i32) -> (i32, i32) {
    %c0_i32 = arith.constant 0 : i32
    %c0_i32_0 = arith.constant 0 : i32
    return %arg1, %c0_i32 : i32, i32
  }
  func.func @transform_4(%arg0: i32, %arg1: i32, %arg2: i32) -> (i32, i32) {
    %c0_i32 = arith.constant 0 : i32
    %c0_i32_0 = arith.constant 0 : i32
    %c0_i32_1 = arith.constant 0 : i32
    return %c0_i32, %c0_i32_0 : i32, i32
  }
  func.func @transform_5(%arg0: i32, %arg1: i32, %arg2: i32) -> (i32, i32) {
    %c0_i32 = arith.constant 0 : i32
    %c0_i32_0 = arith.constant 0 : i32
    return %arg0, %c0_i32 : i32, i32
  }
}

</mosaic_0001>

<bundles_post_ra>
// kernel: tpu_custom_call.1
= control target key start
LH: loop header
LB: loop body
LE: loop exit
PB: predicated region body
PF: predicated region fallthrough
CT: control target
= control target key end

     0   :  { %10 = vsyncpa [#allocation5], 0  ;;  %s587_s0 = inlined_call_operand.hbm [shape: f32[16,128], index: 0, kind: input, shape index: {}]   ;;  %s588_s1 = inlined_call_operand.hbm [shape: f32[128,128], index: 1, kind: input, shape index: {}]   ;;  %s589_s2 = inlined_call_operand.vmem [shape: f32[1,128], index: 2, kind: input, shape index: {}]   ;;  %s590_s3 = inlined_call_operand.hbm [shape: f32[128,128], index: 3, kind: input, shape index: {}]   ;;  %s591_s4 = inlined_call_operand.vmem [shape: f32[1,128], index: 4, kind: input, shape index: {}]   ;;  %s592_s5 = inlined_call_operand.hbm [shape: f32[16,128], index: 5, kind: output, shape index: {}]  }
   0x1   :  { %11 = vsyncpa [#allocation8], 0 }
   0x2   :  { %12 = vsyncpa [#allocation6], 0  ;;  %s521_s18 = smov [#allocation7]   ;;  %s522_s20 = smov [#allocation4]  }
   0x3   :  { %s30_s19 = sshll.u32 %s521_s18, 4  ;;  %s18_s21 = sshll.u32 %s522_s20, 4  ;;  %s31_s19 = int_to_ptr.vmem [resolvable:$true] %s30_s19  ;;  %s19_s21 = int_to_ptr.vmem [resolvable:$true] %s18_s21 }
   0x4   :  { %s443_s22 = scalar_lea.vmem %s31_s19, 2048  ;;  %p448_p1 = scmp.lt.s32.totalorder %s31_s19, %s31_s19 }
   0x5   :  { %p444_p0 = scmp.ne.s32.totalorder %s31_s19, %s443_s22  ;;  %p449_p2 = scmp.lt.s32.totalorder %s443_s22, %s443_s22 }
   0x7   :  { %p450_p3 = por %p449_p2, %p448_p1 }
   0x9   :  { %p451_p4 = pnand %p450_p3, %p444_p0 }
   0xb   :  { %454 = shalt.err (!%p451_p4)
}
   0xc   :  { %s523_s23 = smov 128   ;;  %s524_s24 = smov 8  }
   0xd   :  { %36 = dma.hbm_to_vmem [thread:$0]  %s588_s1, 2048, %s31_s19, [#allocation8], %s523_s23, %s523_s23, %s524_s24  }
   0xe   :  { %s463_s27 = scalar_lea.vmem %s19_s21, 256  ;;  %p468_p6 = scmp.lt.s32.totalorder %s19_s21, %s19_s21 }
   0xf   :  { %p464_p5 = scmp.ne.s32.totalorder %s19_s21, %s463_s27  ;;  %p469_p7 = scmp.lt.s32.totalorder %s463_s27, %s463_s27 }
  0x11   :  { %p470_p8 = por %p469_p7, %p468_p6 }
  0x13   :  { %p471_p9 = pnand %p470_p8, %p464_p5 }
  0x15   :  { %474 = shalt.err (!%p471_p9)
}
  0x16   :  { %24 = dma.hbm_to_vmem [thread:$0]  %s587_s0, 256, %s19_s21, [#allocation5], %s523_s23, %s523_s23, %s524_s24  }
  0x17   :  { %s525_s30 = smov [#allocation9]  }
  0x18   :  { %s44_s6 = sshll.u32 %s525_s30, 4  ;;  %s45_s6 = int_to_ptr.vmem [resolvable:$true] %s44_s6 }
  0x19   :  { %s483_s7 = scalar_lea.vmem %s45_s6, 2048  ;;  %p488_p11 = scmp.lt.s32.totalorder %s45_s6, %s45_s6 }
  0x1a   :  { %p484_p10 = scmp.ne.s32.totalorder %s45_s6, %s483_s7  ;;  %p489_p12 = scmp.lt.s32.totalorder %s483_s7, %s483_s7 }
  0x1c   :  { %p490_p13 = por %p489_p12, %p488_p11 }
  0x1e   :  { %p491_p0 = pnand %p490_p13, %p484_p10 }
  0x20   :  { %494 = shalt.err (!%p491_p0)
}
  0x21   :  { %50 = dma.hbm_to_vmem [thread:$0]  %s590_s3, 2048, %s45_s6, [#allocation8], %s523_s23, %s523_s23, %s524_s24  }
  0x22   :  { %515 = dma.done.wait [#allocation5], 256  }
  0x23   :  { %516 = vsyncadd [#allocation5], 4294967040 }
  0x24   :  { %517 = dma.done.wait [#allocation8], 4096  }
  0x25   :  { %518 = vsyncadd [#allocation8], 4294963200  ;;  %v94_v0 = vld [vmem:[#allocation7 + $0x78] sm:$0xff]  ;;  %v93_v1 = vld [vmem:[#allocation7 + $0x70] sm:$0xff]  ;;  %s526_s11 = smov [#allocation10]  }
  0x26   :  { %359 = vmatprep.subr.mxu0 %v94_v0  ;;  %v92_v2 = vld [vmem:[#allocation7 + $0x68] sm:$0xff]  ;;  %v91_v3 = vld [vmem:[#allocation7 + $0x60] sm:$0xff]  ;;  %v77_v4 = vld [vmem:[#allocation4] sm:$0xff]  ;;  %s308_s12 = sshll.u32 %s526_s11, 4  ;;  %s309_s12 = int_to_ptr.vmem [resolvable:$true] %s308_s12 }
  0x27   :  { %360 = vmatpush3.msra.mxu0 %v94_v0  ;;  %v90_v5 = vld [vmem:[#allocation7 + $0x58] sm:$0xff]  ;;  %391 = vmatprep.mubr.f32.mxu0 %v77_v4  ;;  %v206_v7 = vld [vmem:[#allocation9 + $0x70] sm:$0xff]  ;;  %v205_v9 = vld [vmem:[#allocation9 + $0x68] sm:$0xff]  ;;  %p500_p2 = scmp.lt.s32.totalorder %s309_s12, %s309_s12 }
  0x28   :  { %361 = vmatprep.subr.mxu0 %v93_v1  ;;  %v207_v6 = vld [vmem:[#allocation9 + $0x78] sm:$0xff]  ;;  %v89_v8 = vld [vmem:[#allocation7 + $0x50] sm:$0xff]  ;;  %v88_v10 = vld [vmem:[#allocation7 + $0x48] sm:$0xff] }
  0x29   :  { %362 = vmatpush3.msra.mxu0 %v93_v1  ;;  %394 = vmatprep.subr.mxu1 %v207_v6  ;;  %v204_v11 = vld [vmem:[#allocation9 + $0x60] sm:$0xff]  ;;  %v203_v13 = vld [vmem:[#allocation9 + $0x58] sm:$0xff]  ;;  %v202_v15 = vld [vmem:[#allocation9 + $0x50] sm:$0xff] }
  0x2a   :  { %363 = vmatprep.subr.mxu0 %v92_v2  ;;  %395 = vmatpush3.msra.mxu1 %v207_v6  ;;  %v87_v12 = vld [vmem:[#allocation7 + $0x40] sm:$0xff]  ;;  %v86_v14 = vld [vmem:[#allocation7 + $0x38] sm:$0xff]  ;;  %v85_v16 = vld [vmem:[#allocation7 + $0x30] sm:$0xff] }
  0x2b   :  { %364 = vmatpush3.msra.mxu0 %v92_v2  ;;  %396 = vmatprep.subr.mxu1 %v206_v7  ;;  %v201_v17 = vld [vmem:[#allocation9 + $0x48] sm:$0xff]  ;;  %v200_v19 = vld [vmem:[#allocation9 + $0x40] sm:$0xff]  ;;  %v199_v21 = vld [vmem:[#allocation9 + $0x38] sm:$0xff] }
  0x2c   :  { %365 = vmatprep.subr.mxu0 %v91_v3  ;;  %397 = vmatpush3.msra.mxu1 %v206_v7  ;;  %v84_v18 = vld [vmem:[#allocation7 + $0x28] sm:$0xff]  ;;  %v83_v20 = vld [vmem:[#allocation7 + $0x20] sm:$0xff]  ;;  %v82_v22 = vld [vmem:[#allocation7 + $0x18] sm:$0xff] }
  0x2d   :  { %366 = vmatpush3.msra.mxu0 %v91_v3  ;;  %398 = vmatprep.subr.mxu1 %v205_v9  ;;  %v198_v23 = vld [vmem:[#allocation9 + $0x30] sm:$0xff]  ;;  %v197_v25 = vld [vmem:[#allocation9 + $0x28] sm:$0xff]  ;;  %v196_v27 = vld [vmem:[#allocation9 + $0x20] sm:$0xff] }
  0x2e   :  { %367 = vmatprep.subr.mxu0 %v90_v5  ;;  %399 = vmatpush3.msra.mxu1 %v205_v9  ;;  %v81_v24 = vld [vmem:[#allocation7 + $0x10] sm:$0xff]  ;;  %v80_v26 = vld [vmem:[#allocation7 + $0x8] sm:$0xff]  ;;  %v79_v28 = vld [vmem:[#allocation7] sm:$0xff] }
  0x2f   :  { %368 = vmatpush3.msra.mxu0 %v90_v5  ;;  %400 = vmatprep.subr.mxu1 %v204_v11  ;;  %v78_v29 = vld [vmem:[#allocation4 + $0x8] sm:$0xff]  ;;  %v194_v31 = vld [vmem:[#allocation9 + $0x10] sm:$0xff]  ;;  %v193_v32 = vld [vmem:[#allocation9 + $0x8] sm:$0xff] }
  0x30   :  { %369 = vmatprep.subr.mxu0 %v89_v8  ;;  %401 = vmatpush3.msra.mxu1 %v204_v11  ;;  %v195_v30 = vld [vmem:[#allocation9 + $0x18] sm:$0xff]  ;;  %v192_v33 = vld [vmem:[#allocation9] sm:$0xff]  ;;  %v321_v34 = vld [vmem:[%s589_s2] ss:$0 sm:$0xff]  ;;  %s495_s2 = scalar_lea.vmem %s309_s12, 256 }
  0x31   :  { %370 = vmatpush3.msra.mxu0 %v89_v8  ;;  %402 = vmatprep.subr.mxu1 %v203_v13  ;;  %v322_v41 = vld [vmem:[%s591_s4] ss:$0 sm:$0xff]  ;;  %p496_p1 = scmp.ne.s32.totalorder %s309_s12, %s495_s2  ;;  %p501_p3 = scmp.lt.s32.totalorder %s495_s2, %s495_s2 }
  0x32   :  { %371 = vmatprep.subr.mxu0 %v88_v10  ;;  %403 = vmatpush3.msra.mxu1 %v203_v13 }
  0x33   :  { %372 = vmatpush3.msra.mxu0 %v88_v10  ;;  %404 = vmatprep.subr.mxu1 %v202_v15  ;;  %p502_p4 = por %p501_p3, %p500_p2 }
  0x34   :  { %373 = vmatprep.subr.mxu0 %v87_v12  ;;  %405 = vmatpush3.msra.mxu1 %v202_v15 }
  0x35   :  { %374 = vmatpush3.msra.mxu0 %v87_v12  ;;  %406 = vmatprep.subr.mxu1 %v201_v17  ;;  %p503_p5 = pnand %p502_p4, %p496_p1 }
  0x36   :  { %375 = vmatprep.subr.mxu0 %v86_v14  ;;  %407 = vmatpush3.msra.mxu1 %v201_v17 }
  0x37   :  { %376 = vmatpush3.msra.mxu0 %v86_v14  ;;  %408 = vmatprep.subr.mxu1 %v200_v19 }
  0x38   :  { %377 = vmatprep.subr.mxu0 %v85_v16  ;;  %409 = vmatpush3.msra.mxu1 %v200_v19 }
  0x39   :  { %378 = vmatpush3.msra.mxu0 %v85_v16  ;;  %410 = vmatprep.subr.mxu1 %v199_v21 }
  0x3a   :  { %379 = vmatprep.subr.mxu0 %v84_v18  ;;  %411 = vmatpush3.msra.mxu1 %v199_v21 }
  0x3b   :  { %380 = vmatpush3.msra.mxu0 %v84_v18  ;;  %412 = vmatprep.subr.mxu1 %v198_v23 }
  0x3c   :  { %381 = vmatprep.subr.mxu0 %v83_v20  ;;  %413 = vmatpush3.msra.mxu1 %v198_v23 }
  0x3d   :  { %382 = vmatpush3.msra.mxu0 %v83_v20  ;;  %414 = vmatprep.subr.mxu1 %v197_v25 }
  0x3e   :  { %383 = vmatprep.subr.mxu0 %v82_v22  ;;  %415 = vmatpush3.msra.mxu1 %v197_v25 }
  0x3f   :  { %384 = vmatpush3.msra.mxu0 %v82_v22  ;;  %416 = vmatprep.subr.mxu1 %v196_v27 }
  0x40   :  { %385 = vmatprep.subr.mxu0 %v81_v24  ;;  %417 = vmatpush3.msra.mxu1 %v196_v27 }
  0x41   :  { %386 = vmatpush3.msra.mxu0 %v81_v24  ;;  %418 = vmatprep.subr.mxu1 %v195_v30 }
  0x42   :  { %387 = vmatprep.subr.mxu0 %v80_v26  ;;  %419 = vmatpush3.msra.mxu1 %v195_v30 }
  0x43   :  { %388 = vmatpush3.msra.mxu0 %v80_v26  ;;  %420 = vmatprep.subr.mxu1 %v194_v31 }
  0x44   :  { %389 = vmatprep.subr.mxu0 %v79_v28  ;;  %421 = vmatpush3.msra.mxu1 %v194_v31 }
  0x45   :  { %390 = vmatpush3.msra.mxu0 %v79_v28  ;;  %422 = vmatprep.subr.mxu1 %v193_v32 }
  0x46   :  { %392 = vmatmul.mubr.f32.vlgmr.msra.gmra.mxu0 %v78_v29  ;;  %423 = vmatpush3.msra.mxu1 %v193_v32 }
  0x47   :  { %424 = vmatprep.subr.mxu1 %v192_v33 }
  0x48   :  { %425 = vmatpush3.msra.mxu1 %v192_v33 }
 0x106   :  { %v393_v35 = vpop.f32.mrf.mxu0 }
 0x107   :  { %v187_v36 = vadd.f32 %v393_v35, %v321_v34 }
 0x108   :  { %v161_v37 = vpop.f32.mrf.mxu0 }
 0x109   :  { %v186_v38 = vadd.f32 %v321_v34, %v161_v37  ;;  %v189_v40 = vmax.f32 %v187_v36, 0.0 }
 0x10b   :  { %v188_v39 = vmax.f32 %v186_v38, 0.0 }
 0x10d   :  { %426 = vmatprep.mubr.f32.mxu1 %v188_v39 }
 0x10e   :  { %427 = vmatmul.mubr.f32.vlgmr.msra.gmra.mxu1 %v189_v40 }
 0x1ce   :  { %v428_v42 = vpop.f32.mrf.mxu1 }
 0x1cf   :  { %v300_v43 = vadd.f32 %v428_v42, %v322_v41 }
 0x1d0   :  { %v274_v44 = vpop.f32.mrf.mxu1 }
 0x1d1   :  { %302 = vst [vmem:[#allocation10 + $0x8] sm:$0xff] %v300_v43  ;;  %v299_v45 = vadd.f32 %v322_v41, %v274_v44 }
 0x1d3   :  { %301 = vst [vmem:[#allocation10] sm:$0xff] %v299_v45 }
 0x1d4   :  { %506 = shalt.err (!%p503_p5)
}
 0x1d5   :  { %314 = dma.vmem_to_hbm [thread:$0]  %s309_s12, 256, %s592_s5, [#allocation6], %s523_s23, %s523_s23, %s524_s24  }
 0x1d6   :  { %519 = dma.done.wait [#allocation6], 256  }
 0x1d7   :  { %520 = vsyncadd [#allocation6], 4294967040 }
 0x1d8   :  { %318 = vsyncpa [#allocation5], 1 }
 0x1d9   :  { %319 = vsyncpa [#allocation8], 1 }
 0x1da   :  { %320 = vsyncpa [#allocation6], 1 }

</bundles_post_ra>
